<compile_context>
chip_gen: v7x
topology: tpu7x:2x2x1
jax: 0.10.0
libtpu: 0.0.40
codegen_flags: <defaults>
</compile_context>

<pallas_src>
import functools

import jax
import jax.numpy as jnp
from jax.experimental import pallas as pl
from jax.experimental.pallas import tpu as pltpu


def _round_up(x, m):
    return (x + m - 1) // m * m


# ----------------------------------------------------------------------------
# Kernel 1: normalize + zero-pad (elementwise hot path of preprocess_inputs)
# ----------------------------------------------------------------------------
def _normalize_pad_kernel(mean_ref, inv_std_ref, img_ref, out_ref,
                          *, H, W, new_H, new_W):
    c = pl.program_id(1)
    mean = mean_ref[c]          # SMEM scalar read (per-channel)
    inv_std = inv_std_ref[c]    # precomputed reciprocal -> single VPU mul
    x = (img_ref[...] - mean) * inv_std
    # Every output element is stored exactly once: valid region + pad strips.
    out_ref[:, :, :H, :W] = x
    if new_W > W:
        out_ref[:, :, :H, W:] = jnp.zeros((1, 1, H, new_W - W), out_ref.dtype)
    if new_H > H:
        out_ref[:, :, H:, :] = jnp.zeros((1, 1, new_H - H, new_W), out_ref.dtype)


def normalize_and_pad(images, pixel_mean, pixel_std):
    """(images - mean) * (1/std), zero-padded so H, W are multiples of 32 (NCHW)."""
    B, C, H, W = images.shape
    new_H = H if H % 32 == 0 else H + (32 - H % 32)
    new_W = W if W % 32 == 0 else W + (32 - W % 32)
    mean = pixel_mean.reshape(C).astype(jnp.float32)
    inv_std = (1.0 / pixel_std.reshape(C)).astype(jnp.float32)
    # TODO(synk): at large resolutions (e.g. 1024x1024) tile the H axis
    # (block (1,1,tH,new_W)) to stay within v7x's 64 MiB VMEM.
    kernel = functools.partial(
        _normalize_pad_kernel, H=H, W=W, new_H=new_H, new_W=new_W)
    out = pl.pallas_call(
        kernel,
        out_shape=jax.ShapeDtypeStruct((B, C, new_H, new_W), jnp.float32),
        grid_spec=pltpu.PrefetchScalarGridSpec(
            num_scalar_prefetch=2,          # mean, inv_std -> SMEM
            grid=(B, C),
            in_specs=[
                pl.BlockSpec((1, 1, H, W), lambda b, c, m, s: (b, c, 0, 0)),
            ],
            out_specs=pl.BlockSpec(
                (1, 1, new_H, new_W), lambda b, c, m, s: (b, c, 0, 0)),
        ),
        compiler_params=pltpu.CompilerParams(
            dimension_semantics=("parallel", "parallel")),
    )(mean, inv_std, images.astype(jnp.float32))
    return out, H, W


# ----------------------------------------------------------------------------
# Kernel 2: tiled matmul + bias + activation (backbone / decoder hot path)
# ----------------------------------------------------------------------------
def _matmul_bias_act_kernel(x_ref, w_ref, b_ref, o_ref, acc_ref, *, act):
    @pl.when(pl.program_id(2) == 0)
    def _():
        acc_ref[...] = jnp.zeros_like(acc_ref)

    # bf16 operands, f32 MXU accumulation.
    acc_ref[...] += jnp.dot(x_ref[...], w_ref[...],
                            preferred_element_type=jnp.float32)

    @pl.when(pl.program_id(2) == pl.num_programs(2) - 1)
    def _():
        y = acc_ref[...] + b_ref[...]          # f32 epilogue (v5e-safe)
        if act == "gelu":
            y = jax.nn.gelu(y, approximate=True)
        elif act == "sigmoid":
            y = jax.nn.sigmoid(y)
        o_ref[...] = y.astype(o_ref.dtype)


def matmul_bias_act(x, w, b, act):
    M, K = x.shape
    K2, N = w.shape
    assert K == K2 and N % 128 == 0, (K, K2, N)

    # Tile sizes: lane-dense N tiles (128/256), K tiles 128-512, M tile <=128.
    tm = 128 if M >= 128 else _round_up(M, 16)
    tn = 256 if N % 256 == 0 else 128
    tk = 512 if K % 512 == 0 else (256 if K % 256 == 0 else 128)
    Mp = _round_up(M, tm)
    Kp = _round_up(K, tk)

    x = x.astype(jnp.bfloat16)
    w = w.astype(jnp.bfloat16)
    if (Mp, Kp) != (M, K):
        x = jnp.pad(x, ((0, Mp - M), (0, Kp - K)))
    if Kp != K:
        w = jnp.pad(w, ((0, Kp - K), (0, 0)))
    b2 = b.reshape(1, N).astype(jnp.float32)

    kernel = functools.partial(_matmul_bias_act_kernel, act=act)
    out = pl.pallas_call(
        kernel,
        out_shape=jax.ShapeDtypeStruct((Mp, N), jnp.float32),
        grid_spec=pltpu.PrefetchScalarGridSpec(
            num_scalar_prefetch=0,
            grid=(Mp // tm, N // tn, Kp // tk),
            in_specs=[
                pl.BlockSpec((tm, tk), lambda i, j, k: (i, k)),
                pl.BlockSpec((tk, tn), lambda i, j, k: (k, j)),
                pl.BlockSpec((1, tn), lambda i, j, k: (0, j)),
            ],
            out_specs=pl.BlockSpec((tm, tn), lambda i, j, k: (i, j)),
            scratch_shapes=[pltpu.VMEM((tm, tn), jnp.float32)],
        ),
        compiler_params=pltpu.CompilerParams(
            dimension_semantics=("parallel", "parallel", "arbitrary")),
    )(x, w, b2)
    if Mp != M:
        out = out[:M]
    return out


# ----------------------------------------------------------------------------
# ViTMatte meta-architecture (eval / inference path)
# ----------------------------------------------------------------------------
class ViTMattePallas:
    PATCH = 16
    EMBED = 128   # multiple of 128 -> lane-dense MXU output

    def __init__(self, key, in_chans=4):
        k1, k2 = jax.random.split(key, 2)
        P, D = self.PATCH, self.EMBED
        pdim = in_chans * P * P
        # Deterministic synthetic parameters (injected backbone/decoder stand-ins),
        # stored bf16 so the MXU runs bf16 x bf16 -> f32.
        self.w_embed = (jax.random.normal(k1, (pdim, D), jnp.float32) * 0.02
                        ).astype(jnp.bfloat16)
        self.b_embed = jnp.zeros((D,), jnp.float32)
        self.w_dec = (jax.random.normal(k2, (D, P * P), jnp.float32) * 0.02
                      ).astype(jnp.bfloat16)
        self.b_dec = jnp.zeros((P * P,), jnp.float32)
        # register_buffer('pixel_mean'/'pixel_std') equivalents (4-ch ViTMatte input).
        self.pixel_mean = jnp.array([123.675, 116.280, 103.530, 0.0], jnp.float32)
        self.pixel_std = jnp.array([58.395, 57.120, 57.375, 1.0], jnp.float32)

    # --- forward (eval path) -------------------------------------------------
    def forward(self, batched_inputs):
        images, H, W = self.preprocess_inputs(batched_inputs)
        features = self.backbone(images)
        outputs = self.decoder(features, images)
        # eval-mode crop back to the original (unpadded) resolution
        outputs["phas"] = outputs["phas"][:, :, :H, :W]
        return outputs

    def preprocess_inputs(self, batched_inputs):
        images = batched_inputs["image"]
        # NOTE: self.image = images[-1].permute(1,2,0).cpu().numpy() is a host-side
        # visualization side-effect; intentionally skipped.
        # TODO(synk): training-mode trimap thresholding and criterion(losses) are
        # not implemented — only the inference path of forward() is reproduced.
        return normalize_and_pad(images, self.pixel_mean, self.pixel_std)

    # --- synthetic backbone: ViT patch-embed (Pallas tiled matmul + GELU) ----
    def backbone(self, images):
        B, C, Hp, Wp = images.shape
        P = self.PATCH
        nH, nW = Hp // P, Wp // P
        # TODO(synk): fold patch extraction into the matmul kernel's index_map so
        # the im2col transpose does not round-trip HBM outside the kernel.
        patches = images.reshape(B, C, nH, P, nW, P)
        patches = patches.transpose(0, 2, 4, 1, 3, 5).reshape(B * nH * nW, C * P * P)
        feats = matmul_bias_act(patches, self.w_embed, self.b_embed, act="gelu")
        return feats.reshape(B, nH, nW, self.EMBED), (Hp, Wp)

    # --- synthetic decoder: per-patch linear + sigmoid -> alpha matte --------
    def decoder(self, features, images):
        feats, (Hp, Wp) = features
        B, nH, nW, D = feats.shape
        P = self.PATCH
        alpha = matmul_bias_act(
            feats.reshape(B * nH * nW, D), self.w_dec, self.b_dec, act="sigmoid"
        )
        alpha = (
            alpha.reshape(B, nH, nW, P, P)
            .transpose(0, 1, 3, 2, 4)
            .reshape(B, 1, Hp, Wp)
        )
        return {"phas": alpha}


if __name__ == "__main__":
    key = jax.random.PRNGKey(0)
    kimg, kmod = jax.random.split(key)
    # Small, non-multiple-of-32 spatial size so the padding branch is exercised:
    # 40 -> padded to 64.
    B, C, H, W = 2, 4, 40, 40
    image = jax.random.uniform(kimg, (B, C, H, W), jnp.float32, 0.0, 255.0)

    model = ViTMattePallas(kmod, in_chans=C)
    outputs = model.forward({"image": image})
    phas = jax.block_until_ready(outputs["phas"])

    assert phas.shape == (B, 1, H, W), phas.shape
    assert bool(jnp.all(jnp.isfinite(phas)))
    print("KERNEL_OK")
</pallas_src>

<mosaic_0001>
module attributes {stable_mosaic.version = 11 : i64} {
  func.func @_normalize_pad_kernel(%arg0: i32, %arg1: i32, %arg2: memref<4xf32, #tpu.memory_space<smem>>, %arg3: memref<4xf32, #tpu.memory_space<smem>>, %arg4: memref<1x1x40x40xf32, #tpu.memory_space<vmem>>, %arg5: memref<1x1x64x64xf32, #tpu.memory_space<vmem>>) attributes {dimension_semantics = [#tpu.dimension_semantics<parallel>, #tpu.dimension_semantics<parallel>], iteration_bounds = array<i64: 2, 4>, scalar_prefetch = 2 : i64, scratch_operands = 0 : i64, tpu.core_type = #tpu.core_type<tc>, window_params = [{transform_indices = @transform_0, window_bounds = array<i64: 1, 1, 40, 40>}, {transform_indices = @transform_1, window_bounds = array<i64: 1, 1, 64, 64>}]} {
    %0 = arith.index_cast %arg1 : i32 to index
    %1 = memref.load %arg2[%0] : memref<4xf32, #tpu.memory_space<smem>>
    %2 = arith.index_cast %arg1 : i32 to index
    %3 = memref.load %arg3[%2] : memref<4xf32, #tpu.memory_space<smem>>
    %c0 = arith.constant 0 : index
    %c0_0 = arith.constant 0 : index
    %c0_1 = arith.constant 0 : index
    %c0_2 = arith.constant 0 : index
    %4 = vector.load %arg4[%c0, %c0_0, %c0_1, %c0_2] : memref<1x1x40x40xf32, #tpu.memory_space<vmem>>, vector<1x1x40x40xf32>
    %5 = vector.broadcast %1 : f32 to vector<1x1x40x40xf32>
    %6 = arith.subf %4, %5 : vector<1x1x40x40xf32>
    %7 = vector.broadcast %3 : f32 to vector<1x1x40x40xf32>
    %8 = arith.mulf %6, %7 : vector<1x1x40x40xf32>
    %c0_3 = arith.constant 0 : index
    %c0_4 = arith.constant 0 : index
    %c0_5 = arith.constant 0 : index
    %c0_6 = arith.constant 0 : index
    %9 = vector.load %arg5[%c0_3, %c0_4, %c0_5, %c0_6] : memref<1x1x64x64xf32, #tpu.memory_space<vmem>>, vector<1x1x40x40xf32>
    tpu.vector_store %arg5[%c0_3, %c0_4, %c0_5, %c0_6], %8 {strides = array<i32>} : memref<1x1x64x64xf32, #tpu.memory_space<vmem>>, vector<1x1x40x40xf32>,
    %cst = arith.constant 0.000000e+00 : f32
    %10 = vector.broadcast %cst : f32 to vector<1x1x40x24xf32>
    %c0_7 = arith.constant 0 : index
    %c0_8 = arith.constant 0 : index
    %c0_9 = arith.constant 0 : index
    %c40 = arith.constant 40 : index
    %11 = vector.load %arg5[%c0_7, %c0_8, %c0_9, %c40] : memref<1x1x64x64xf32, #tpu.memory_space<vmem>>, vector<1x1x40x24xf32>
    tpu.vector_store %arg5[%c0_7, %c0_8, %c0_9, %c40], %10 {strides = array<i32>} : memref<1x1x64x64xf32, #tpu.memory_space<vmem>>, vector<1x1x40x24xf32>,
    %cst_10 = arith.constant 0.000000e+00 : f32
    %12 = vector.broadcast %cst_10 : f32 to vector<1x1x24x64xf32>
    %c0_11 = arith.constant 0 : index
    %c0_12 = arith.constant 0 : index
    %c40_13 = arith.constant 40 : index
    %c0_14 = arith.constant 0 : index
    %13 = vector.load %arg5[%c0_11, %c0_12, %c40_13, %c0_14] : memref<1x1x64x64xf32, #tpu.memory_space<vmem>>, vector<1x1x24x64xf32>
    tpu.vector_store %arg5[%c0_11, %c0_12, %c40_13, %c0_14], %12 {strides = array<i32>} : memref<1x1x64x64xf32, #tpu.memory_space<vmem>>, vector<1x1x24x64xf32>,
    return
  }
  func.func @transform_0(%arg0: i32, %arg1: i32, %arg2: memref<4xf32, #tpu.memory_space<smem>>, %arg3: memref<4xf32, #tpu.memory_space<smem>>) -> (i32, i32, i32, i32) {
    %c0_i32 = arith.constant 0 : i32
    %c0_i32_0 = arith.constant 0 : i32
    %c0_i32_1 = arith.constant 0 : i32
    return %arg0, %arg1, %c0_i32, %c0_i32_0 : i32, i32, i32, i32
  }
  func.func @transform_1(%arg0: i32, %arg1: i32, %arg2: memref<4xf32, #tpu.memory_space<smem>>, %arg3: memref<4xf32, #tpu.memory_space<smem>>) -> (i32, i32, i32, i32) {
    %c0_i32 = arith.constant 0 : i32
    %c0_i32_0 = arith.constant 0 : i32
    %c0_i32_1 = arith.constant 0 : i32
    return %arg0, %arg1, %c0_i32, %c0_i32_0 : i32, i32, i32, i32
  }
}

</mosaic_0001>

<bundles_post_ra>
// kernel: tpu_custom_call.1
= control target key start
LH: loop header
LB: loop body
LE: loop exit
PB: predicated region body
PF: predicated region fallthrough
CT: control target
= control target key end

     0   :  { %s818_s0 = inlined_call_operand.hbm [shape: f32[4], index: 0, kind: input, shape index: {}]   ;;  %s819_s2 = inlined_call_operand.hbm [shape: f32[2,4,40,40], index: 2, kind: input, shape index: {}]   ;;  %s820_s3 = inlined_call_operand.hbm [shape: f32[2,4,64,64], index: 3, kind: output, shape index: {}]   ;;  %s821_s1 = inlined_call_operand.vmem [shape: f32[4], index: 1, kind: input, shape index: {}]  }
   0x1   :  { %s406_s14 = scalar_lea.hbm %s818_s0, 16 }
   0x2   :  { %p407_p0 = scmp.ne.s32.totalorder %s818_s0, %s406_s14  ;;  %p410_p1 = scmp.lt.u32.totalorder %s406_s14, %s818_s0 }
   0x4   :  { %p412_p2 = pnand %p410_p1, %p407_p0 }
   0x6   :  { %415 = shalt.err (!%p412_p2)  }
   0x7   :  { %s560_s19 = smov [#allocation3]   ;;  %s10_s24 = sshll.u32 %s821_s1, 4  ;;  %s11_s24 = int_to_ptr.vmem [resolvable:$true] %s10_s24 }
   0x8   :  { %9 = dma.hbm_to_smem %s818_s0, 16, %s560_s19, [#allocation2] }
   0x9   :  { %s416_s25 = scalar_lea.vmem %s11_s24, 16  ;;  %p421_p4 = scmp.lt.s32.totalorder %s11_s24, %s11_s24 }
   0xa   :  { %p417_p3 = scmp.ne.s32.totalorder %s11_s24, %s416_s25  ;;  %p422_p5 = scmp.lt.s32.totalorder %s416_s25, %s416_s25 }
   0xc   :  { %p423_p6 = por %p422_p5, %p421_p4 }
   0xe   :  { %p424_p7 = pnand %p423_p6, %p417_p3 }
  0x10   :  { %427 = shalt.err (!%p424_p7)  }
  0x11   :  { %s561_s26 = smov [#allocation4]  }
  0x12   :  { %13 = dma.vmem_to_smem %s11_s24, 16, %s561_s26, [#allocation2] }
  0x13   :  { %518 = dma.done.wait [#allocation2], 32 }
  0x14   :  { %519 = vsyncadd [#allocation2], 4294967264 }
  0x15   :  { %15 = sfence }
  0x16   :  { %16 = vsyncpa [#allocation6], 0 }
  0x17   :  { %18 = vsyncpa [#allocation6 + $0x1], 0 }
  0x18   :  { %19 = vsyncpa [#allocation7], 0 }
  0x19   :  { %21 = vsyncpa [#allocation7 + $0x1], 0  ;;  %s604_s0 = smov 0   ;;  %s606_s1 = smov 0  }
  0x1a   :  { %s608_s27 = smov 0   ;;  %s610_s28 = smov 0  }
  0x1b   :  { %s612_s29 = smov 0   ;;  %s614_s30 = smov 0  }
  0x1c   :  { %s616_s4 = smov 0   ;;  %s618_s5 = smov 0  }
  0x1d LB: > { %s304_s6 = sadd.s32 4294967295, %s558_s5   ;;  %s305_s7 = sadd.s32 4294967294, %s558_s5   ;;  %s558_s5 = sphi %s618_s5, %s27_s5   ;;  %s554_s4 = sphi %s616_s4, %s836_s4   ;;  %s550_s30 = sphi %s614_s30, %s835_s30   ;;  %s546_s29 = sphi %s612_s29, %s834_s29   ;;  %s542_s28 = sphi %s610_s28, %s833_s28   ;;  %s538_s27 = sphi %s608_s27, %s832_s27   ;;  %s534_s1 = sphi %s606_s1, %s831_s1   ;;  %s530_s0 = sphi %s604_s0, %s830_s0  }
  0x1e   : > { %s36_s8 = sadd.s32 1, %s550_s30  ;;  %s39_s9 = sadd.s32 1, %s554_s4 }
  0x1f   : > { %p37_p8 = scmp.ge.s32.totalorder %s36_s8, 4  ;;  %s48_s10 = sadd.s32 1, %s538_s27 }
  0x20   : > { %p55_p9 = scmp.ne.s32.totalorder %s538_s27, %s534_s1  ;;  %p56_p10 = scmp.eq.s32.totalorder %s558_s5, 0 }
  0x21   : > { %s838_s8 = smov (%p37_p8, %s36_s8), 0  ;;  %s840_s9 = smov (!%p37_p8, %s39_s9), %s554_s4 }
  0x22   : > { %s44_s11 = ssub.s32 %s550_s30, %s838_s8  ;;  %p657_p11 = por %p56_p10, %p55_p9 }
  0x23   : > { %p41_p12 = scmp.ge.s32.totalorder %s840_s9, 2  ;;  %p61_p13 = scmp.ne.s32.totalorder %s534_s1, %s530_s0 }
  0x24   : > { %p62_p0 = scmp.eq.s32.totalorder %s304_s6, 0  ;;  %p87_p1 = scmp.eq.s32.totalorder %s304_s6, 7 }
  0x25   : > { %s842_s9 = smov (%p41_p12, %s840_s9), 0  ;;  %p93_p4 = scmp.eq.s32.totalorder %s305_s7, 7 }
  0x26   : > { %p665_p2 = por %p62_p0, %p61_p13  ;;  %p669_p3 = por %p87_p1, %p55_p9 }
  0x27   : > { %s43_s15 = ssub.s32 %s554_s4, %s842_s9  ;;  %p675_p6 = por %p93_p4, %p61_p13 }
  0x28   : > { %s825_s14 = scalar_select %p669_p3, 1, 0 }
  0x29   : > { %s45_s16 = sor.u32 %s44_s11, %s43_s15  ;;  %p333_p7 = scmp.lt.s32.totalorder %s558_s5, 8 }
  0x2a   : > { %p46_p5 = scmp.eq.s32.totalorder %s45_s16, 0  ;;  %s113_s18 = sand.u32 1, %s538_s27  }
  0x2b   : > { %s826_s17 = scalar_select %p675_p6, 1, 0 }
  0x2c   : > { %s682_s19 = scalar_select %p46_p5, %s538_s27, %s48_s10  }
  0x2d   : > { %s317_s20 = smul.u32 40, %s113_s18  ;;  %p687_p8 = pnand %p333_p7, %p657_p11 }
  0x2e   : > { %s318_s21 = smul.u32 5, %s550_s30  ;;  %s699_s12 = scalar_lea.sflag [#allocation6], %s113_s18 }
  0x2f   : > { %s319_s23 = smul.u32 20, %s554_s4  ;;  %s117_s24 = scalar_lea.vmem [#allocation5], %s317_s20 }
  0x30   : > { %s126_s25 = sshll.u32 %s117_s24, 4  ;;  %p430_p10 = pneg %p687_p8  ;;  %s692_s25 = int_to_ptr.vmem [resolvable:$true] %s126_s25 }
  0x31   : > { %s123_s26 = sadd.s32 %s319_s23, %s318_s21  ;;  %s433_s21 = scalar_lea.hbm %s819_s2, 5120 }
  0x32   : > { %s308_s6 = sshll.u32 %s123_s26, 7 }
  0x33   : > { %s697_s10 = scalar_lea.hbm %s819_s2, %s308_s6 }
  0x34   : > { %s428_s15 = scalar_lea.hbm %s697_s10, 640  ;;  %p434_p13 = scmp.lt.u32.totalorder %s697_s10, %s819_s2 }
  0x35   : > { %p429_p9 = scmp.ne.s32.totalorder %s697_s10, %s428_s15  ;;  %p435_p0 = scmp.lt.u32.totalorder %s433_s21, %s428_s15 }
  0x36   : > { %p437_p4 = scmp.lt.u32.totalorder %s428_s15, %s697_s10 }
  0x37   : > { %p431_p11 = pnand %p430_p10, %p429_p9  ;;  %p436_p1 = por %p435_p0, %p434_p13 }
  0x39   : > { %p432_p12 = pneg %p431_p11  ;;  %p438_p5 = por %p437_p4, %p436_p1 }
  0x3b   : > { %p439_p7 = pnand %p438_p5, %p432_p12 }
  0x3d   : > { %442 = shalt.err (!%p439_p7)
}
  0x3e   : > { %s443_s18 = scalar_lea.vmem %s692_s25, 640  ;;  %s562_s26 = smov [#allocation5]  }
  0x3f   : > { %p444_p9 = scmp.ne.s32.totalorder %s692_s25, %s443_s18  ;;  %s448_s6 = sshll.u32 %s562_s26, 4  ;;  %s449_s6 = int_to_ptr.vmem [resolvable:$false] %s448_s6 }
  0x40   : > { %s450_s7 = scalar_lea.vmem %s449_s6, 1280  ;;  %p451_p3 = scmp.lt.s32.totalorder %s692_s25, %s449_s6 }
  0x41   : > { %p446_p11 = pnand %p444_p9, %p430_p10  ;;  %p452_p13 = scmp.lt.s32.totalorder %s450_s7, %s443_s18 }
  0x43   : > { %p447_p6 = pneg %p446_p11  ;;  %p453_p0 = por %p452_p13, %p451_p3 }
  0x45   : > { %p454_p1 = pnand %p453_p0, %p447_p6 }
  0x47   : > { %457 = shalt.err (!%p454_p1)
}
  0x48   : > { %s563_s11 = smov 128   ;;  %s564_s15 = smov 8  }
  0x49   : > { %328 = dma.hbm_to_vmem [thread:$0]  (!%p687_p8), %s697_s10, 640, %s692_s25, %s699_s12, %s563_s11, %s563_s11, %s564_s15  }
  0x4a   : > { %p309_p10 = scmp.ge.s32.totalorder %s558_s5, 1  ;;  %p134_p12 = scmp.lt.s32.totalorder %s558_s5, 9 }
  0x4c   : > { %p135_p4 = pnand %p309_p10, %p134_p12 }
  0x4d   : > { %s730_s16 = sand.u32 (!%p135_p4), 1, %s534_s1  }
  0x4e   : > { %138 = sbr.rel (%p135_p4) target bundleno = 117 (0x75), region = 24  ;;  %s141_s21 = scalar_lea.sflag (!%p135_p4), [#allocation6], %s730_s16 }
  0x4f   : > { %s320_s20 = smul.u32 (!%p135_p4), 40, %s730_s16 }
  0x51   : > { %s144_s23 = scalar_lea.vmem (!%p135_p4), [#allocation5], %s320_s20 }
  0x55   : > { %521 = dma.done.wait (%p665_p2), %s141_s21, 640  }
  0x56   : > { %523 = vsyncadd (%p665_p2), %s141_s21, 4294966656  ;;  %s310_s22 = sshll.u32 %s730_s16, 6  ;;  %vm194_vm0 = vcmask 523264   ;;  %s163_s25 = sld [smem:[#allocation3 + %s542_s28]]  ;;  %v565_v0 = vmov 0.0   ;;  %v165_v1 = vld [vmem:[%s144_s23] sm:$0xff] }
  0x57   : > { %s164_s10 = sld [smem:[#allocation4 + %s542_s28]]  ;;  %s741_s12 = scalar_lea.vmem [#allocation8], %s310_s22  ;;  %v166_v3 = vld [vmem:[%s144_s23 + $0x8] sm:$0xff]  ;;  %v167_v4 = vld [vmem:[%s144_s23 + $0x10] sm:$0xff]  ;;  %v168_v9 = vld [vmem:[%s144_s23 + $0x18] sm:$0xff]  ;;  %vm182_vm1 = vcmask 326656  }
  0x58   : > { %195 = vst.msk [vmem:[%s741_s12 + $0x28] sm:$0xff] %vm194_vm0, %v565_v0  ;;  %196 = vst.msk [vmem:[%s741_s12 + $0x30] sm:$0xff] %vm194_vm0, %v565_v0  ;;  %s312_s13 = sshll.u32 %s542_s28, 3  ;;  %s313_s24 = sshll.u32 %s546_s29, 5  ;;  %v169_v10 = vld [vmem:[%s144_s23 + $0x20] sm:$0xff]  ;;  %vm188_vm2 = vcmask 523584  }
  0x59   : > { %197 = vst.msk [vmem:[%s741_s12 + $0x38] sm:$0xff] %vm194_vm0, %v565_v0  ;;  %s211_s18 = sadd.s32 %s313_s24, %s312_s13  ;;  %s214_s6 = sshll.u32 %s741_s12, 4  ;;  %s754_s6 = int_to_ptr.vmem [resolvable:$true] %s214_s6 }
  0x5a   : > { %s314_s26 = sshll.u32 %s211_s18, 7  ;;  %s199_s11 = scalar_lea.sflag [#allocation7], %s730_s16 }
  0x5b   : > { %s752_s7 = scalar_lea.hbm %s820_s3, %s314_s26  ;;  %s458_s15 = scalar_lea.vmem %s754_s6, 1024 }
  0x5c   : > { %v170_v2 = vstv %s163_s25  ;;  %p459_p2 = scmp.ne.s32.totalorder %s754_s6, %s458_s15  ;;  %p828_p3 = scmp.ne.s32.totalorder %s825_s14, 0 }
  0x5d   : > { %v171_v5 = vsub.f32 %v165_v1, %v170_v2  ;;  %v176_v6 = vstv %s164_s10  ;;  %v172_v7 = vsub.f32 %v166_v3, %v170_v2  ;;  %v173_v8 = vsub.f32 %v167_v4, %v170_v2  ;;  %s566_s20 = smov [#allocation8]  }
  0x5e   : > { %v174_v11 = vsub.f32 %v168_v9, %v170_v2  ;;  %v175_v12 = vsub.f32 %v169_v10, %v170_v2  ;;  %p460_p6 = pnand %p459_p2, %p828_p3  ;;  %s462_s21 = sshll.u32 %s566_s20, 4  ;;  %s463_s21 = int_to_ptr.vmem [resolvable:$false] %s462_s21 }
  0x5f   : > { %v177_v13 = vmul.f32 %v176_v6, %v171_v5  ;;  %v178_v14 = vmul.f32 %v176_v6, %v172_v7  ;;  %v179_v15 = vmul.f32 %v176_v6, %v173_v8  ;;  %s464_s23 = scalar_lea.vmem %s463_s21, 2048  ;;  %p465_p5 = scmp.lt.s32.totalorder %s754_s6, %s463_s21 }
  0x60   : > { %v180_v16 = vmul.f32 %v176_v6, %v174_v11  ;;  %v181_v17 = vmul.f32 %v176_v6, %v175_v12  ;;  %p461_p8 = pneg %p460_p6  ;;  %p466_p7 = scmp.lt.s32.totalorder %s464_s23, %s458_s15 }
  0x61   : > { %183 = vst.msk [vmem:[%s741_s12] sm:$0xff] %vm182_vm1, %v177_v13  ;;  %184 = vst.msk [vmem:[%s741_s12 + $0x8] sm:$0xff] %vm182_vm1, %v178_v14 }
  0x62   : > { %185 = vst.msk [vmem:[%s741_s12 + $0x10] sm:$0xff] %vm182_vm1, %v179_v15  ;;  %186 = vst.msk [vmem:[%s741_s12 + $0x18] sm:$0xff] %vm182_vm1, %v180_v16  ;;  %p467_p9 = por %p466_p7, %p465_p5 }
  0x63   : > { %187 = vst.msk [vmem:[%s741_s12 + $0x20] sm:$0xff] %vm182_vm1, %v181_v17 }
  0x64   : > { %189 = vst.msk [vmem:[%s741_s12] sm:$0xff] %vm188_vm2, %v565_v0  ;;  %190 = vst.msk [vmem:[%s741_s12 + $0x8] sm:$0xff] %vm188_vm2, %v565_v0  ;;  %p468_p11 = pnand %p467_p9, %p461_p8 }
  0x65   : > { %191 = vst.msk [vmem:[%s741_s12 + $0x10] sm:$0xff] %vm188_vm2, %v565_v0  ;;  %192 = vst.msk [vmem:[%s741_s12 + $0x18] sm:$0xff] %vm188_vm2, %v565_v0 }
  0x66   : > { %193 = vst.msk [vmem:[%s741_s12 + $0x20] sm:$0xff] %vm188_vm2, %v565_v0 }
  0x67   : > { %471 = shalt.err (!%p468_p11)
}
  0x68   : > { %s472_s22 = scalar_lea.hbm %s752_s7, 1024  ;;  %s476_s12 = scalar_lea.hbm %s820_s3, 8192 }
  0x69   : > { %p473_p13 = scmp.ne.s32.totalorder %s752_s7, %s472_s22  ;;  %p477_p10 = scmp.lt.u32.totalorder %s752_s7, %s820_s3 }
  0x6a   : > { %p478_p12 = scmp.lt.u32.totalorder %s476_s12, %s472_s22  ;;  %p480_p2 = scmp.lt.u32.totalorder %s472_s22, %s752_s7 }
  0x6b   : > { %p474_p0 = pnand %p473_p13, %p828_p3 }
  0x6c   : > { %p479_p4 = por %p478_p12, %p477_p10 }
  0x6d   : > { %p475_p1 = pneg %p474_p0 }
  0x6e   : > { %p481_p6 = por %p480_p2, %p479_p4 }
  0x70   : > { %p482_p8 = pnand %p481_p6, %p475_p1 }
  0x72   : > { %485 = shalt.err (!%p482_p8)
}
  0x73   : > { %s567_s18 = smov 128   ;;  %s568_s26 = smov 8  }
  0x74   : > { %323 = dma.vmem_to_hbm [thread:$0]  (%p828_p3), %s754_s6, 1024, %s752_s7, %s199_s11, %s567_s18, %s567_s18, %s568_s26  }
  0x75 PF: > { %p334_p5 = scmp.ge.s32.totalorder %s558_s5, 2  ;;  %s229_s28 = sand.u32 1, %s530_s0  }
  0x76   : > { %p829_p7 = scmp.ne.s32.totalorder %s826_s17, 0  ;;  %s230_s29 = scalar_lea.sflag [#allocation7], %s229_s28 }
  0x78   : > { %p330_p9 = pnand %p334_p5, %p829_p7 }
  0x7a   : > { %525 = dma.done.wait (!%p330_p9), %s230_s29, 1024  }
  0x7b   : > { %527 = vsyncadd (!%p330_p9), %s230_s29, 4294966272  ;;  %s27_s5 = sadd.s32 1, %s558_s5   ;;  %s830_s0 = smov %s534_s1 }
  0x7c   : > { %p24_p11 = scmp.ge.s32.totalorder %s27_s5, 10   ;;  %s831_s1 = smov %s538_s27 }
  0x7d   : > { %s832_s27 = smov %s682_s19  ;;  %s833_s28 = smov %s550_s30 }
  0x7e   : > { %s834_s29 = smov %s554_s4  ;;  %s835_s30 = smov %s838_s8 }
  0x7f   : > { %s836_s4 = smov %s842_s9  ;;  %26 = sbr.rel (!%p24_p11) target bundleno = 29 (0x1d), region = 69 }
  0x86   :  { %235 = vsyncpa [#allocation6], 1 }
  0x87   :  { %237 = vsyncpa [#allocation6 + $0x1], 1 }
  0x88   :  { %238 = vsyncpa [#allocation7], 1 }
  0x89   :  { %240 = vsyncpa [#allocation7 + $0x1], 1 }

</bundles_post_ra>
